<compile_context>
chip_gen: v7x
topology: tpu7x:2x2x1
jax: 0.10.0
libtpu: 0.0.40
codegen_flags: <defaults>
</compile_context>

<pallas_src>
import jax
import jax.numpy as jnp
from jax.experimental import pallas as pl
from jax.experimental.pallas import tpu as pltpu


# ---------------------------------------------------------------------------
# Kernels
# ---------------------------------------------------------------------------
def _mm_resident_kernel(x_ref, w_ref, y_ref):
    # y = x @ W   (MXU matmul, f32 accumulation); W resident across the grid.
    y_ref[...] = jnp.dot(
        x_ref[...], w_ref[...], preferred_element_type=jnp.float32
    ).astype(y_ref.dtype)


def _mm_tiled_kernel(x_ref, w_ref, y_ref, acc_ref):
    # K-tiled matmul with f32 accumulator scratch; used when W cannot be held
    # resident in VMEM.  Grid = (batch, N, K); K is the reduction axis.
    @pl.when(pl.program_id(2) == 0)
    def _init():
        acc_ref[...] = jnp.zeros_like(acc_ref)

    acc_ref[...] += jnp.dot(
        x_ref[...], w_ref[...], preferred_element_type=jnp.float32
    )

    @pl.when(pl.program_id(2) == pl.num_programs(2) - 1)
    def _store():
        y_ref[...] = acc_ref[...].astype(y_ref.dtype)


# ---------------------------------------------------------------------------
# Helpers
# ---------------------------------------------------------------------------
def _round_up(x, m):
    return (x + m - 1) // m * m


def _round_down(x, m):
    return (x // m) * m


def _tpu_kind():
    try:
        return jax.devices()[0].device_kind.lower()
    except Exception:
        return ""


def _vmem_budget():
    """Per-generation (vmem_limit_bytes, tile_budget_bytes, num_tensorcores)."""
    kind = _tpu_kind()
    if ("v5" in kind) or ("v6" in kind):
        phys, num_tc = 128 << 20, 1          # v5e / v6e: 128 MiB VMEM, 1 TC
    else:
        phys, num_tc = 64 << 20, 2           # v7x-class (or unknown): 64 MiB/TC, 2 TC
    limit = min(phys - (16 << 20), 96 << 20)  # headroom for Mosaic internal scratch
    budget = limit - (8 << 20)                # headroom for semaphores / slack
    return int(limit), int(budget), int(num_tc)


def _sublane_align(itemsize):
    # f32 -> 8 rows, bf16 -> 16, int8/fp8 -> 32 (sub-32-bit packs along sublanes)
    return 8 * max(1, 4 // itemsize)


def _pick_batch_tile_resident(B, Dp, itemsize, budget):
    """Largest batch tile whose double-buffered x/y streams plus the
    single-buffered resident W fit the VMEM budget."""
    align = _sublane_align(itemsize)
    w_bytes = Dp * Dp * itemsize              # single-buffered (pl.Buffered(1))
    per_row = 2 * 2 * Dp * itemsize           # x + y tiles, 2 buffers each
    tb = max((budget - w_bytes) // per_row, align)
    tb = min(tb, 1024, max(B, align))         # diminishing returns past ~1K rows
    if tb >= 128:
        tb = _round_down(tb, 128)             # clean 128x128 MXU cadence
    else:
        tb = max(_round_down(tb, align), align)
    return int(tb)


def _pick_tiles_large_w(B, Dp, itemsize, budget):
    """Tile sizes for the K/N-tiled path (W too large to keep resident)."""
    tk = tn = max(t for t in (512, 256, 128) if Dp % t == 0)
    align = _sublane_align(itemsize)
    w_bytes = 2 * tk * tn * itemsize                  # W tile, double-buffered
    per_row = 2 * (tk + tn) * itemsize + tn * 4       # x/y streams + f32 acc
    tb = max((budget - w_bytes) // per_row, align)
    tb = min(tb, 1024, max(B, align))
    if tb >= 128:
        tb = _round_down(tb, 128)
    else:
        tb = max(_round_down(tb, align), align)
    return int(tb), int(tn), int(tk)


def _single_buffered_spec(block_shape, index_map):
    # W's index_map is constant -> double-buffering it is pure VMEM waste.
    try:
        return pl.BlockSpec(block_shape, index_map, pipeline_mode=pl.Buffered(1))
    except TypeError:  # older BlockSpec without pipeline_mode kwarg
        return pl.BlockSpec(block_shape, index_map)


# ---------------------------------------------------------------------------
# Public wrapper (matches InvertibleMM.forward semantics)
# ---------------------------------------------------------------------------
def invertible_mm(x, W, mode="direct", force_pallas=False):
    """Returns (x @ W, log|det W| repeated to (B, 1)) in 'direct' mode and
    (x @ inv(W), -log|det W| repeated) otherwise."""
    B, D = x.shape
    assert W.shape == (D, D)
    itemsize = jnp.dtype(x.dtype).itemsize

    # TODO(synk): slogdet (LU factorization) and matrix inverse have no clean
    # Pallas equivalent; they are tiny (D, D) ops and run in plain JAX glue.
    _, logabsdet = jnp.linalg.slogdet(W.astype(jnp.float32))
    if mode == "direct":
        mat = W.astype(x.dtype)            # same-dtype pair for the MXU
        ld = logabsdet
    else:
        # Inverse is computed in f32, then cast to x.dtype so the MXU sees a
        # same-dtype (possibly narrow) pair; in-kernel accumulation is f32.
        # Note: for bf16 inputs this trades a little round-trip precision for
        # the narrow MXU fast path.
        mat = jnp.linalg.inv(W.astype(jnp.float32)).astype(x.dtype)
        ld = -logabsdet

    # log|det| broadcast stays outside the kernel (a (B, 1) kernel output
    # would lower to lane-width-1 masked vst.msk stores).  Returned as f32.
    logdet = jnp.broadcast_to(ld.astype(jnp.float32).reshape(1, 1), (B, 1))

    # Small-problem fallback: for a one-vreg-scale matmul, launch + per-step
    # overhead makes the Pallas path strictly slower than the fused XLA op.
    if not force_pallas and B * max(D, 128) * itemsize < (1 << 20):
        return (x @ mat), logdet

    limit, budget, num_tc = _vmem_budget()

    # Lane-dense padding: round the feature dim up to 128 so output stores are
    # full unmasked 128-lane vst's.  Padded x columns are zero, so padded W
    # rows/cols contribute nothing; the result is sliced back to D.
    Dp = _round_up(D, 128)
    if Dp != D:
        x_p = jnp.pad(x, ((0, 0), (0, Dp - D)))
        mat_p = jnp.pad(mat, ((0, Dp - D), (0, Dp - D)))
    else:
        x_p, mat_p = x, mat

    cost = pl.CostEstimate(
        flops=2 * B * Dp * Dp,
        transcendentals=0,
        bytes_accessed=itemsize * (2 * B * Dp + Dp * Dp),
    )

    w_resident = Dp * Dp * itemsize <= budget // 4
    if w_resident:
        TB = _pick_batch_tile_resident(B, Dp, itemsize, budget)
        # Give both TensorCores work on 2-TC chips (v7x-class).
        if num_tc > 1 and B >= 512 and pl.cdiv(B, TB) < num_tc:
            TB = max(_round_down(TB // num_tc, 128), 256)
        grid = (pl.cdiv(B, TB),)
        y_p = pl.pallas_call(
            _mm_resident_kernel,
            out_shape=jax.ShapeDtypeStruct((B, Dp), x.dtype),
            grid=grid,
            in_specs=[
                pl.BlockSpec((TB, Dp), lambda i: (i, 0)),          # x (batch tile)
                _single_buffered_spec((Dp, Dp), lambda i: (0, 0)),  # W (resident)
            ],
            out_specs=pl.BlockSpec((TB, Dp), lambda i: (i, 0)),
            compiler_params=pltpu.CompilerParams(
                dimension_semantics=("parallel",),
                vmem_limit_bytes=limit,
            ),
            cost_estimate=cost,
        )(x_p, mat_p)
    else:
        # Large-D path: tile W over (K, N) with an f32 accumulator so the
        # batch tile does not collapse and W never has to fit whole in VMEM.
        TB, TN, TK = _pick_tiles_large_w(B, Dp, itemsize, budget)
        grid = (pl.cdiv(B, TB), Dp // TN, Dp // TK)
        y_p = pl.pallas_call(
            _mm_tiled_kernel,
            out_shape=jax.ShapeDtypeStruct((B, Dp), x.dtype),
            grid=grid,
            in_specs=[
                pl.BlockSpec((TB, TK), lambda i, j, k: (i, k)),
                pl.BlockSpec((TK, TN), lambda i, j, k: (k, j)),
            ],
            out_specs=pl.BlockSpec((TB, TN), lambda i, j, k: (i, j)),
            scratch_shapes=[pltpu.VMEM((TB, TN), jnp.float32)],
            compiler_params=pltpu.CompilerParams(
                dimension_semantics=("parallel", "parallel", "arbitrary"),
                vmem_limit_bytes=limit,
            ),
            cost_estimate=cost,
        )(x_p, mat_p)

    y = y_p[:, :D] if Dp != D else y_p
    return y, logdet


def init_orthogonal_weight(key, num_inputs, dtype=jnp.float32):
    """Deterministic orthogonal init (mirrors nn.init.orthogonal_)."""
    a = jax.random.normal(key, (num_inputs, num_inputs), dtype=jnp.float32)
    q, r = jnp.linalg.qr(a)
    q = q * jnp.sign(jnp.diag(r))[None, :]   # sign-consistent decomposition
    return q.astype(dtype)


if __name__ == "__main__":
    key = jax.random.PRNGKey(0)
    k_w, k_x = jax.random.split(key)

    batch = 8
    num_inputs = 32

    W = init_orthogonal_weight(k_w, num_inputs)
    x = jax.random.normal(k_x, (batch, num_inputs), dtype=jnp.float32)

    # direct mode (force the Pallas path so the kernel itself is exercised)
    y, logdet = invertible_mm(x, W, mode="direct", force_pallas=True)
    y = jax.block_until_ready(y)
    logdet = jax.block_until_ready(logdet)

    # reference check (plain JAX)
    y_ref = x @ W
    _, lad_ref = jnp.linalg.slogdet(W)
    logdet_ref = jnp.broadcast_to(lad_ref.reshape(1, 1), (batch, 1))

    assert y.shape == (batch, num_inputs)
    assert logdet.shape == (batch, 1)
    assert jnp.allclose(y, y_ref, atol=1e-5, rtol=1e-5)
    assert jnp.allclose(logdet, logdet_ref, atol=1e-5, rtol=1e-5)

    # inverse mode round-trip: (x @ W) @ inv(W) == x
    x_rec, logdet_inv = invertible_mm(y, W, mode="inverse", force_pallas=True)
    x_rec = jax.block_until_ready(x_rec)
    assert jnp.allclose(x_rec, x, atol=1e-4, rtol=1e-4)
    assert jnp.allclose(logdet_inv, -logdet_ref, atol=1e-5, rtol=1e-5)

    print("KERNEL_OK")
</pallas_src>

<mosaic_0001>
module attributes {stable_mosaic.version = 11 : i64} {
  func.func @_mm_resident_kernel(%arg0: i32, %arg1: memref<8x128xf32, #tpu.memory_space<vmem>>, %arg2: memref<128x128xf32, #tpu.memory_space<vmem>>, %arg3: memref<8x128xf32, #tpu.memory_space<vmem>>) attributes {dimension_semantics = [#tpu.dimension_semantics<parallel>], iteration_bounds = array<i64: 1>, scalar_prefetch = 0 : i64, scratch_operands = 0 : i64, tpu.core_type = #tpu.core_type<tc>, window_params = [{transform_indices = @transform_0, window_bounds = array<i64: 8, 128>}, {pipeline_mode = #tpu.pipeline_mode<synchronous>, transform_indices = @transform_1, window_bounds = array<i64: 128, 128>}, {transform_indices = @transform_2, window_bounds = array<i64: 8, 128>}]} {
    %c0 = arith.constant 0 : index
    %c0_0 = arith.constant 0 : index
    %0 = vector.load %arg1[%c0, %c0_0] : memref<8x128xf32, #tpu.memory_space<vmem>>, vector<8x128xf32>
    %c0_1 = arith.constant 0 : index
    %c0_2 = arith.constant 0 : index
    %1 = vector.load %arg2[%c0_1, %c0_2] : memref<128x128xf32, #tpu.memory_space<vmem>>, vector<128x128xf32>
    %cst = arith.constant dense<0.000000e+00> : vector<8x128xf32>
    %2 = tpu.matmul %0, %1, %cst {dimension_numbers = #tpu.dot_dimension_numbers<[1], [0], [0], [1], [0, 0, 1, 1], [], []>} : vector<8x128xf32>, vector<128x128xf32>, vector<8x128xf32> -> vector<8x128xf32>
    %c0_3 = arith.constant 0 : index
    %c0_4 = arith.constant 0 : index
    %3 = vector.load %arg3[%c0_3, %c0_4] : memref<8x128xf32, #tpu.memory_space<vmem>>, vector<8x128xf32>
    tpu.vector_store %arg3[%c0_3, %c0_4], %2 {strides = array<i32>} : memref<8x128xf32, #tpu.memory_space<vmem>>, vector<8x128xf32>,
    return
  }
  func.func @transform_0(%arg0: i32) -> (i32, i32) {
    %c0_i32 = arith.constant 0 : i32
    %c0_i32_0 = arith.constant 0 : i32
    return %arg0, %c0_i32 : i32, i32
  }
  func.func @transform_1(%arg0: i32) -> (i32, i32) {
    %c0_i32 = arith.constant 0 : i32
    %c0_i32_0 = arith.constant 0 : i32
    %c0_i32_1 = arith.constant 0 : i32
    return %c0_i32, %c0_i32_0 : i32, i32
  }
  func.func @transform_2(%arg0: i32) -> (i32, i32) {
    %c0_i32 = arith.constant 0 : i32
    %c0_i32_0 = arith.constant 0 : i32
    return %arg0, %c0_i32 : i32, i32
  }
}

</mosaic_0001>

<bundles_post_ra>
// kernel: tpu_custom_call.1
= control target key start
LH: loop header
LB: loop body
LE: loop exit
PB: predicated region body
PF: predicated region fallthrough
CT: control target
= control target key end

     0   :  { %7 = vsyncpa [#allocation3], 0  ;;  %s364_s0 = inlined_call_operand.hbm [shape: f32[8,128], index: 0, kind: input, shape index: {}]   ;;  %s365_s1 = inlined_call_operand.hbm [shape: f32[128,128], index: 1, kind: input, shape index: {}]   ;;  %s366_s2 = inlined_call_operand.hbm [shape: f32[8,128], index: 2, kind: output, shape index: {}]  }
   0x1   :  { %8 = vsyncpa [#allocation6], 0 }
   0x2   :  { %9 = vsyncpa [#allocation4], 0  ;;  %s298_s9 = smov [#allocation2]   ;;  %s299_s11 = smov [#allocation5]  }
   0x3   :  { %s16_s10 = sshll.u32 %s298_s9, 4  ;;  %s25_s12 = sshll.u32 %s299_s11, 4  ;;  %s17_s10 = int_to_ptr.vmem [resolvable:$true] %s16_s10  ;;  %s321_s12 = int_to_ptr.vmem [resolvable:$true] %s25_s12 }
   0x4   :  { %s226_s15 = scalar_lea.hbm %s364_s0, 128 }
   0x5   :  { %p227_p0 = scmp.ne.s32.totalorder %s364_s0, %s226_s15  ;;  %p230_p1 = scmp.lt.u32.totalorder %s226_s15, %s364_s0 }
   0x7   :  { %p232_p2 = pnand %p230_p1, %p227_p0 }
   0x9   :  { %235 = shalt.err (!%p232_p2)
}
   0xa   :  { %s236_s20 = scalar_lea.vmem %s17_s10, 128  ;;  %p241_p4 = scmp.lt.s32.totalorder %s17_s10, %s17_s10 }
   0xb   :  { %p237_p3 = scmp.ne.s32.totalorder %s17_s10, %s236_s20  ;;  %p242_p5 = scmp.lt.s32.totalorder %s236_s20, %s236_s20 }
   0xd   :  { %p243_p6 = por %p242_p5, %p241_p4 }
   0xf   :  { %p244_p7 = pnand %p243_p6, %p237_p3 }
  0x11   :  { %247 = shalt.err (!%p244_p7)
}
  0x12   :  { %19 = dma.hbm_to_vmem [thread:$0]  %s364_s0, 128, %s17_s10, [#allocation3]  }
  0x13   :  { %s248_s25 = scalar_lea.hbm %s365_s1, 2048 }
  0x14   :  { %p249_p8 = scmp.ne.s32.totalorder %s365_s1, %s248_s25  ;;  %p252_p9 = scmp.lt.u32.totalorder %s248_s25, %s365_s1 }
  0x16   :  { %p254_p10 = pnand %p252_p9, %p249_p8 }
  0x18   :  { %257 = shalt.err (!%p254_p10)
}
  0x19   :  { %s258_s30 = scalar_lea.vmem %s321_s12, 2048  ;;  %p263_p12 = scmp.lt.s32.totalorder %s321_s12, %s321_s12 }
  0x1a   :  { %p259_p11 = scmp.ne.s32.totalorder %s321_s12, %s258_s30  ;;  %p264_p13 = scmp.lt.s32.totalorder %s258_s30, %s258_s30 }
  0x1c   :  { %p265_p0 = por %p264_p13, %p263_p12 }
  0x1e   :  { %p266_p1 = pnand %p265_p0, %p259_p11 }
  0x20   :  { %269 = shalt.err (!%p266_p1)
}
  0x21   :  { %s300_s0 = smov 128   ;;  %s301_s3 = smov 8  }
  0x22   :  { %31 = dma.hbm_to_vmem [thread:$0]  %s365_s1, 2048, %s321_s12, [#allocation6], %s300_s0, %s300_s0, %s301_s3  }
  0x23   :  { %292 = dma.done.wait [#allocation3], 128  }
  0x24   :  { %293 = vsyncadd [#allocation3], 4294967168 }
  0x25   :  { %294 = dma.done.wait [#allocation6], 2048  }
  0x26   :  { %295 = vsyncadd [#allocation6], 4294965248  ;;  %v302_v0 = vmov 0.0|0.0   ;;  %vm303_vm0 = vmmov 0   ;;  %v304_v1 = vmov 0.0   ;;  %v39_v2 = vld [vmem:[#allocation5] sm:$0xff] }
  0x27   :  { %194 = vmatprep.subr.bf16.mxu0 %v302_v0  ;;  %191 = vmatprep.mubr.msk.f32.mxu0 %vm303_vm0, %v304_v1  ;;  %v40_v3 = vld [vmem:[#allocation5 + $0x8] sm:$0xff]  ;;  %v41_v4 = vld [vmem:[#allocation5 + $0x10] sm:$0xff]  ;;  %v42_v6 = vld [vmem:[#allocation5 + $0x18] sm:$0xff]  ;;  %s305_s1 = smov [#allocation7]  }
  0x28   :  { %v195_v5 = vpack.c.bf16 %v40_v3, %v39_v2  ;;  %v198_v7 = vpack.c.bf16 %v42_v6, %v41_v4  ;;  %v43_v8 = vld [vmem:[#allocation5 + $0x20] sm:$0xff]  ;;  %v44_v9 = vld [vmem:[#allocation5 + $0x28] sm:$0xff]  ;;  %v45_v11 = vld [vmem:[#allocation5 + $0x30] sm:$0xff]  ;;  %s132_s6 = sshll.u32 %s305_s1, 4  ;;  %s133_s6 = int_to_ptr.vmem [resolvable:$true] %s132_s6 }
  0x29   :  { %v201_v10 = vpack.c.bf16 %v44_v9, %v43_v8  ;;  %v46_v12 = vld [vmem:[#allocation5 + $0x38] sm:$0xff]  ;;  %v47_v14 = vld [vmem:[#allocation5 + $0x40] sm:$0xff]  ;;  %v48_v15 = vld [vmem:[#allocation5 + $0x48] sm:$0xff]  ;;  %s270_s7 = scalar_lea.vmem %s133_s6, 128  ;;  %p275_p3 = scmp.lt.s32.totalorder %s133_s6, %s133_s6 }
  0x2a   :  { %196 = vmatpush3.bf16.msra.mxu0 %v195_v5  ;;  %v204_v13 = vpack.c.bf16 %v46_v12, %v45_v11  ;;  %v207_v16 = vpack.c.bf16 %v48_v15, %v47_v14  ;;  %v49_v17 = vld [vmem:[#allocation5 + $0x50] sm:$0xff]  ;;  %v50_v18 = vld [vmem:[#allocation5 + $0x58] sm:$0xff]  ;;  %v51_v20 = vld [vmem:[#allocation5 + $0x60] sm:$0xff]  ;;  %p271_p2 = scmp.ne.s32.totalorder %s133_s6, %s270_s7  ;;  %p276_p4 = scmp.lt.s32.totalorder %s270_s7, %s270_s7 }
  0x2b   :  { %197 = vmatprep.subr.bf16.mxu0 %v302_v0  ;;  %v210_v19 = vpack.c.bf16 %v50_v18, %v49_v17  ;;  %v52_v21 = vld [vmem:[#allocation5 + $0x68] sm:$0xff]  ;;  %v53_v23 = vld [vmem:[#allocation5 + $0x70] sm:$0xff]  ;;  %v54_v24 = vld [vmem:[#allocation5 + $0x78] sm:$0xff] }
  0x2c   :  { %v213_v22 = vpack.c.bf16 %v52_v21, %v51_v20  ;;  %v216_v25 = vpack.c.bf16 %v54_v24, %v53_v23  ;;  %v38_v26 = vld [vmem:[#allocation2] sm:$0xff]  ;;  %p277_p5 = por %p276_p4, %p275_p3 }
  0x2e   :  { %199 = vmatpush3.bf16.msra.mxu0 %v198_v7  ;;  %p278_p6 = pnand %p277_p5, %p271_p2 }
  0x2f   :  { %200 = vmatprep.subr.bf16.mxu0 %v302_v0 }
  0x32   :  { %202 = vmatpush3.bf16.msra.mxu0 %v201_v10 }
  0x33   :  { %203 = vmatprep.subr.bf16.mxu0 %v302_v0 }
  0x36   :  { %205 = vmatpush3.bf16.msra.mxu0 %v204_v13 }
  0x37   :  { %206 = vmatprep.subr.bf16.mxu0 %v302_v0 }
  0x3a   :  { %208 = vmatpush3.bf16.msra.mxu0 %v207_v16 }
  0x3b   :  { %209 = vmatprep.subr.bf16.mxu0 %v302_v0 }
  0x3e   :  { %211 = vmatpush3.bf16.msra.mxu0 %v210_v19 }
  0x3f   :  { %212 = vmatprep.subr.bf16.mxu0 %v302_v0 }
  0x42   :  { %214 = vmatpush3.bf16.msra.mxu0 %v213_v22 }
  0x43   :  { %215 = vmatprep.subr.bf16.mxu0 %v302_v0 }
  0x46   :  { %217 = vmatpush3.bf16.msra.mxu0 %v216_v25 }
  0x49   :  { %192 = vmatmul.mubr.f32.vlgmr.msra.gmra.mrb[0].mxu0 %v38_v26 }
 0x11c   :  { %v121_v27 = vpop.f32.mrb[0].mxu0 }
 0x11d   :  { %125 = vst [vmem:[#allocation7] sm:$0xff] %v121_v27  ;;  %v193_v28 = vpop.f32.mrb[1].mxu0 }
 0x11e   :  { %281 = shalt.err (!%p278_p6)
}
 0x11f   :  { %s282_s10 = scalar_lea.hbm %s366_s2, 128 }
 0x120   :  { %p283_p7 = scmp.ne.s32.totalorder %s366_s2, %s282_s10  ;;  %p286_p8 = scmp.lt.u32.totalorder %s282_s10, %s366_s2 }
 0x122   :  { %p288_p9 = pnand %p286_p8, %p283_p7 }
 0x124   :  { %291 = shalt.err (!%p288_p9)
}
 0x125   :  { %135 = dma.vmem_to_hbm [thread:$0]  %s133_s6, 128, %s366_s2, [#allocation4]  }
 0x126   :  { %296 = dma.done.wait [#allocation4], 128  }
 0x127   :  { %297 = vsyncadd [#allocation4], 4294967168 }
 0x128   :  { %139 = vsyncpa [#allocation3], 1 }
 0x129   :  { %140 = vsyncpa [#allocation6], 1 }
 0x12a   :  { %141 = vsyncpa [#allocation4], 1 }

</bundles_post_ra>
